<compile_context>
chip_gen: v7x
topology: tpu7x:2x2x1
jax: 0.10.0
libtpu: 0.0.40
codegen_flags: <defaults>
</compile_context>

<pallas_src>
import functools

import jax
import jax.numpy as jnp
import numpy as np
from jax.experimental import pallas as pl
from jax.experimental.pallas import tpu as pltpu

EPS = 1e-5  # nn.InstanceNorm2d default eps


def _resblock_kernel(x_ref, w1_ref, w2_ref, g_ref,
                     gamma1_ref, beta1_ref, gamma2_ref, beta2_ref,
                     out_ref, *, C):
    _, H, WC = x_ref.shape
    inv_hw = 1.0 / (H * (WC // C))

    x = x_ref[0].astype(jnp.float32)              # (H, W*C) lane-dense image
    G = g_ref[...]                                # (WC, WC) channel-group matrix
    zrow = jnp.zeros((1, WC), jnp.float32)

    def conv3x3(v, w_ref_):
        # Rows h-1 / h / h+1 (zero padded in H). The kw taps and the zero padding in W
        # are encoded in the pre-packed block-banded weight, so the whole 3x3 conv is a
        # single MXU matmul: (H, 3*WC) @ (3*WC, WC).
        up = jnp.concatenate([zrow, v[:H - 1, :]], axis=0)     # source row h-1
        down = jnp.concatenate([v[1:, :], zrow], axis=0)       # source row h+1
        patches = jnp.concatenate([up, v, down], axis=1)       # (H, 3*WC)
        return jnp.dot(patches, w_ref_[...],
                       preferred_element_type=jnp.float32)     # (H, WC)

    def chan_mean(t):
        # Per-channel mean over all H*W pixels, broadcast back across the W lane groups
        # (G[j, j'] = 1 iff j % C == j' % C), done as matmul + sublane reduce.
        s = jnp.dot(t, G, preferred_element_type=jnp.float32)  # (H, WC)
        return jnp.sum(s, axis=0, keepdims=True) * inv_hw      # (1, WC)

    def instance_norm(y, gamma, beta):
        mean = chan_mean(y)
        d = y - mean
        var = chan_mean(d * d)                                 # biased var (PyTorch IN)
        return d * jax.lax.rsqrt(var + EPS) * gamma + beta

    # --- Conv2dBlock #1: zero-pad conv3x3 (no bias) -> InstanceNorm(affine) -> ReLU ---
    h = conv3x3(x, w1_ref)
    h = instance_norm(h, gamma1_ref[...], beta1_ref[...])
    h = jnp.maximum(h, 0.0)

    # --- Conv2dBlock #2: conv3x3 -> InstanceNorm(affine), activation='none' ---
    h = conv3x3(h, w2_ref)
    h = instance_norm(h, gamma2_ref[...], beta2_ref[...])

    # --- residual add ---
    # TODO(synk): InstanceNorm2d(track_running_stats=True) also mutates running
    # mean/var buffers in training mode; that side effect does not change the forward
    # output and is not replicated here.
    out_ref[0] = (h + x).astype(out_ref.dtype)


def _pack_conv_weight(w_hwio, width):
    """(3,3,Cin,Cout) HWIO -> (3*W*Cin, W*Cout) block-banded weight for the lane-dense conv.

    For each kh, the (WC, WC) band holds W_k[ci, co] at block (w', w) with w' = w + kw - 1;
    out-of-range blocks are simply absent, which implements the zero padding in W.
    """
    bands = []
    for kh in range(3):
        band = sum(jnp.kron(jnp.eye(width, k=1 - kw, dtype=jnp.float32),
                            w_hwio[kh, kw].astype(jnp.float32))
                   for kw in range(3))
        bands.append(band)
    return jnp.concatenate(bands, axis=0)


def _group_matrix(width, C):
    """(W*C, W*C) matrix with G[j, j'] = 1 iff j % C == j' % C (reduce + broadcast over W)."""
    return jnp.kron(jnp.ones((width, width), jnp.float32), jnp.eye(C, dtype=jnp.float32))


def resblock_forward_nhwc(x, w1_hwio, w2_hwio, g1, b1, g2, b2):
    """x: (N, H, W, C) f32; w*_hwio: (3, 3, C, C); g*/b*: (C,)."""
    N, H, W, C = x.shape
    WC = W * C
    assert WC % 128 == 0 and H % 8 == 0, "lane-dense layout needs W*C % 128 == 0 and H % 8 == 0"

    x2d = x.reshape(N, H, WC)                     # lane-dense (N, H, W*C)
    w1p = _pack_conv_weight(w1_hwio, W)           # (3*WC, WC)
    w2p = _pack_conv_weight(w2_hwio, W)
    G = _group_matrix(W, C)                       # (WC, WC)
    gm1 = jnp.tile(g1, W).reshape(1, WC)          # gamma/beta tiled to lane layout
    bt1 = jnp.tile(b1, W).reshape(1, WC)
    gm2 = jnp.tile(g2, W).reshape(1, WC)
    bt2 = jnp.tile(b2, W).reshape(1, WC)

    grid_spec = pltpu.PrefetchScalarGridSpec(
        num_scalar_prefetch=0,
        grid=(N,),
        in_specs=[
            pl.BlockSpec((1, H, WC), lambda n: (n, 0, 0)),     # x (conv input + residual)
            pl.BlockSpec((3 * WC, WC), lambda n: (0, 0)),      # conv1 packed weight
            pl.BlockSpec((3 * WC, WC), lambda n: (0, 0)),      # conv2 packed weight
            pl.BlockSpec((WC, WC), lambda n: (0, 0)),          # channel-group matrix
            pl.BlockSpec((1, WC), lambda n: (0, 0)),           # IN1 gamma (tiled)
            pl.BlockSpec((1, WC), lambda n: (0, 0)),           # IN1 beta
            pl.BlockSpec((1, WC), lambda n: (0, 0)),           # IN2 gamma
            pl.BlockSpec((1, WC), lambda n: (0, 0)),           # IN2 beta
        ],
        out_specs=pl.BlockSpec((1, H, WC), lambda n: (n, 0, 0)),
    )
    out2d = pl.pallas_call(
        functools.partial(_resblock_kernel, C=C),
        out_shape=jax.ShapeDtypeStruct((N, H, WC), x.dtype),
        grid_spec=grid_spec,
        compiler_params=pltpu.CompilerParams(
            dimension_semantics=("parallel",)),
    )(x2d, w1p, w2p, G, gm1, bt1, gm2, bt2)
    return out2d.reshape(N, H, W, C)


def resblock_reference_nhwc(x, w1, w2, g1, b1, g2, b2):
    """Plain-JAX reference of the same math (for validation only)."""
    def conv(z, w):
        return jax.lax.conv_general_dilated(
            z, w, window_strides=(1, 1), padding=((1, 1), (1, 1)),
            dimension_numbers=('NHWC', 'HWIO', 'NHWC'))

    def inorm(y, g, b):
        m = jnp.mean(y, axis=(1, 2), keepdims=True)
        v = jnp.mean((y - m) ** 2, axis=(1, 2), keepdims=True)
        return (y - m) / jnp.sqrt(v + EPS) * g.reshape(1, 1, 1, -1) + b.reshape(1, 1, 1, -1)

    h = jax.nn.relu(inorm(conv(x, w1), g1, b1))
    h = inorm(conv(h, w2), g2, b2)
    return h + x


if __name__ == "__main__":
    # ResBlock(dim=8) on a (2, 8, 16, 16) NCHW input (PyTorch convention).
    N, C, H, W = 2, 8, 16, 16
    key = jax.random.PRNGKey(0)
    k_x, k_w1, k_w2, k_g1, k_b1, k_g2, k_b2 = jax.random.split(key, 7)

    x_nchw = jax.random.normal(k_x, (N, C, H, W), jnp.float32)

    fan_in = C * 3 * 3
    # PyTorch Conv2d weight layout is (C_out, C_in, kH, kW); bias=False.
    w1_oihw = jax.random.normal(k_w1, (C, C, 3, 3), jnp.float32) / np.sqrt(fan_in)
    w2_oihw = jax.random.normal(k_w2, (C, C, 3, 3), jnp.float32) / np.sqrt(fan_in)
    # InstanceNorm2d affine params (deterministic synthetic values).
    g1 = jax.random.uniform(k_g1, (C,), jnp.float32, 0.5, 1.5)
    b1 = 0.1 * jax.random.normal(k_b1, (C,), jnp.float32)
    g2 = jax.random.uniform(k_g2, (C,), jnp.float32, 0.5, 1.5)
    b2 = 0.1 * jax.random.normal(k_b2, (C,), jnp.float32)

    # NCHW -> NHWC and OIHW -> HWIO at the boundary (glue only).
    x = jnp.transpose(x_nchw, (0, 2, 3, 1))
    w1 = jnp.transpose(w1_oihw, (2, 3, 1, 0))
    w2 = jnp.transpose(w2_oihw, (2, 3, 1, 0))

    out = resblock_forward_nhwc(x, w1, w2, g1, b1, g2, b2)
    out = jax.block_until_ready(out)

    ref = resblock_reference_nhwc(x, w1, w2, g1, b1, g2, b2)
    np.testing.assert_allclose(np.asarray(out), np.asarray(ref), rtol=5e-4, atol=5e-4)

    out_nchw = jnp.transpose(out, (0, 3, 1, 2))  # back to PyTorch NCHW
    assert out_nchw.shape == (N, C, H, W)
    print("KERNEL_OK")
</pallas_src>

<mosaic_0001>
module attributes {stable_mosaic.version = 11 : i64} {
  func.func @_resblock_kernel(%arg0: i32, %arg1: memref<1x16x128xf32, #tpu.memory_space<vmem>>, %arg2: memref<384x128xf32, #tpu.memory_space<vmem>>, %arg3: memref<384x128xf32, #tpu.memory_space<vmem>>, %arg4: memref<128x128xf32, #tpu.memory_space<vmem>>, %arg5: memref<1x128xf32, #tpu.memory_space<vmem>>, %arg6: memref<1x128xf32, #tpu.memory_space<vmem>>, %arg7: memref<1x128xf32, #tpu.memory_space<vmem>>, %arg8: memref<1x128xf32, #tpu.memory_space<vmem>>, %arg9: memref<1x16x128xf32, #tpu.memory_space<vmem>>) attributes {dimension_semantics = [#tpu.dimension_semantics<parallel>], iteration_bounds = array<i64: 2>, scalar_prefetch = 0 : i64, scratch_operands = 0 : i64, tpu.core_type = #tpu.core_type<tc>, window_params = [{transform_indices = @transform_0, window_bounds = array<i64: 1, 16, 128>}, {pipeline_mode = #tpu.pipeline_mode<synchronous>, transform_indices = @transform_1, window_bounds = array<i64: 384, 128>}, {pipeline_mode = #tpu.pipeline_mode<synchronous>, transform_indices = @transform_2, window_bounds = array<i64: 384, 128>}, {pipeline_mode = #tpu.pipeline_mode<synchronous>, transform_indices = @transform_3, window_bounds = array<i64: 128, 128>}, {pipeline_mode = #tpu.pipeline_mode<synchronous>, transform_indices = @transform_4, window_bounds = array<i64: 1, 128>}, {pipeline_mode = #tpu.pipeline_mode<synchronous>, transform_indices = @transform_5, window_bounds = array<i64: 1, 128>}, {pipeline_mode = #tpu.pipeline_mode<synchronous>, transform_indices = @transform_6, window_bounds = array<i64: 1, 128>}, {pipeline_mode = #tpu.pipeline_mode<synchronous>, transform_indices = @transform_7, window_bounds = array<i64: 1, 128>}, {transform_indices = @transform_8, window_bounds = array<i64: 1, 16, 128>}]} {
    %c0 = arith.constant 0 : index
    %c0_0 = arith.constant 0 : index
    %c0_1 = arith.constant 0 : index
    %0 = vector.load %arg1[%c0, %c0_0, %c0_1] : memref<1x16x128xf32, #tpu.memory_space<vmem>>, vector<1x16x128xf32>
    %1 = vector.shape_cast %0 : vector<1x16x128xf32> to vector<16x128xf32>
    %c0_2 = arith.constant 0 : index
    %c0_3 = arith.constant 0 : index
    %2 = vector.load %arg4[%c0_2, %c0_3] : memref<128x128xf32, #tpu.memory_space<vmem>>, vector<128x128xf32>
    %cst = arith.constant 0.000000e+00 : f32
    %3 = vector.broadcast %cst : f32 to vector<1x128xf32>
    %4 = vector.extract_strided_slice %1 {offsets = [0, 0], sizes = [15, 128], strides = [1, 1]} : vector<16x128xf32> to vector<15x128xf32>
    %5 = tpu.concatenate %3, %4 in 0 : vector<1x128xf32>, vector<15x128xf32> -> vector<16x128xf32>
    %6 = vector.extract_strided_slice %1 {offsets = [1, 0], sizes = [15, 128], strides = [1, 1]} : vector<16x128xf32> to vector<15x128xf32>
    %7 = tpu.concatenate %6, %3 in 0 : vector<15x128xf32>, vector<1x128xf32> -> vector<16x128xf32>
    %8 = tpu.concatenate %5, %1, %7 in 1 : vector<16x128xf32>, vector<16x128xf32>, vector<16x128xf32> -> vector<16x384xf32>
    %c0_4 = arith.constant 0 : index
    %c0_5 = arith.constant 0 : index
    %9 = vector.load %arg2[%c0_4, %c0_5] : memref<384x128xf32, #tpu.memory_space<vmem>>, vector<384x128xf32>
    %cst_6 = arith.constant dense<0.000000e+00> : vector<16x128xf32>
    %10 = tpu.matmul %8, %9, %cst_6 {dimension_numbers = #tpu.dot_dimension_numbers<[1], [0], [0], [1], [0, 0, 1, 1], [], []>} : vector<16x384xf32>, vector<384x128xf32>, vector<16x128xf32> -> vector<16x128xf32>
    %c0_7 = arith.constant 0 : index
    %c0_8 = arith.constant 0 : index
    %11 = vector.load %arg5[%c0_7, %c0_8] : memref<1x128xf32, #tpu.memory_space<vmem>>, vector<1x128xf32>
    %c0_9 = arith.constant 0 : index
    %c0_10 = arith.constant 0 : index
    %12 = vector.load %arg6[%c0_9, %c0_10] : memref<1x128xf32, #tpu.memory_space<vmem>>, vector<1x128xf32>
    %cst_11 = arith.constant dense<0.000000e+00> : vector<16x128xf32>
    %13 = tpu.matmul %10, %2, %cst_11 {dimension_numbers = #tpu.dot_dimension_numbers<[1], [0], [0], [1], [0, 0, 1, 1], [], []>} : vector<16x128xf32>, vector<128x128xf32>, vector<16x128xf32> -> vector<16x128xf32>
    %cst_12 = arith.constant dense<0.000000e+00> : vector<128xf32>
    %14 = vector.multi_reduction <add>, %13, %cst_12 [0] : vector<16x128xf32> to vector<128xf32>
    %15 = vector.shape_cast %14 : vector<128xf32> to vector<1x128xf32>
    %cst_13 = arith.constant 3.906250e-03 : f32
    %16 = vector.broadcast %cst_13 : f32 to vector<1x128xf32>
    %17 = arith.mulf %15, %16 : vector<1x128xf32>
    %18 = vector.broadcast %17 : vector<1x128xf32> to vector<16x128xf32>
    %19 = arith.subf %10, %18 : vector<16x128xf32>
    %20 = arith.mulf %19, %19 : vector<16x128xf32>
    %cst_14 = arith.constant dense<0.000000e+00> : vector<16x128xf32>
    %21 = tpu.matmul %20, %2, %cst_14 {dimension_numbers = #tpu.dot_dimension_numbers<[1], [0], [0], [1], [0, 0, 1, 1], [], []>} : vector<16x128xf32>, vector<128x128xf32>, vector<16x128xf32> -> vector<16x128xf32>
    %cst_15 = arith.constant dense<0.000000e+00> : vector<128xf32>
    %22 = vector.multi_reduction <add>, %21, %cst_15 [0] : vector<16x128xf32> to vector<128xf32>
    %23 = vector.shape_cast %22 : vector<128xf32> to vector<1x128xf32>
    %cst_16 = arith.constant 3.906250e-03 : f32
    %24 = vector.broadcast %cst_16 : f32 to vector<1x128xf32>
    %25 = arith.mulf %23, %24 : vector<1x128xf32>
    %cst_17 = arith.constant 9.99999974E-6 : f32
    %26 = vector.broadcast %cst_17 : f32 to vector<1x128xf32>
    %27 = arith.addf %25, %26 : vector<1x128xf32>
    %28 = math.rsqrt %27 : vector<1x128xf32>
    %29 = vector.broadcast %28 : vector<1x128xf32> to vector<16x128xf32>
    %30 = arith.mulf %19, %29 : vector<16x128xf32>
    %31 = vector.broadcast %11 : vector<1x128xf32> to vector<16x128xf32>
    %32 = arith.mulf %30, %31 : vector<16x128xf32>
    %33 = vector.broadcast %12 : vector<1x128xf32> to vector<16x128xf32>
    %34 = arith.addf %32, %33 : vector<16x128xf32>
    %cst_18 = arith.constant 0.000000e+00 : f32
    %35 = vector.broadcast %cst_18 : f32 to vector<16x128xf32>
    %36 = arith.maximumf %34, %35 : vector<16x128xf32>
    %37 = vector.extract_strided_slice %36 {offsets = [0, 0], sizes = [15, 128], strides = [1, 1]} : vector<16x128xf32> to vector<15x128xf32>
    %38 = tpu.concatenate %3, %37 in 0 : vector<1x128xf32>, vector<15x128xf32> -> vector<16x128xf32>
    %39 = vector.extract_strided_slice %36 {offsets = [1, 0], sizes = [15, 128], strides = [1, 1]} : vector<16x128xf32> to vector<15x128xf32>
    %40 = tpu.concatenate %39, %3 in 0 : vector<15x128xf32>, vector<1x128xf32> -> vector<16x128xf32>
    %41 = tpu.concatenate %38, %36, %40 in 1 : vector<16x128xf32>, vector<16x128xf32>, vector<16x128xf32> -> vector<16x384xf32>
    %c0_19 = arith.constant 0 : index
    %c0_20 = arith.constant 0 : index
    %42 = vector.load %arg3[%c0_19, %c0_20] : memref<384x128xf32, #tpu.memory_space<vmem>>, vector<384x128xf32>
    %cst_21 = arith.constant dense<0.000000e+00> : vector<16x128xf32>
    %43 = tpu.matmul %41, %42, %cst_21 {dimension_numbers = #tpu.dot_dimension_numbers<[1], [0], [0], [1], [0, 0, 1, 1], [], []>} : vector<16x384xf32>, vector<384x128xf32>, vector<16x128xf32> -> vector<16x128xf32>
    %c0_22 = arith.constant 0 : index
    %c0_23 = arith.constant 0 : index
    %44 = vector.load %arg7[%c0_22, %c0_23] : memref<1x128xf32, #tpu.memory_space<vmem>>, vector<1x128xf32>
    %c0_24 = arith.constant 0 : index
    %c0_25 = arith.constant 0 : index
    %45 = vector.load %arg8[%c0_24, %c0_25] : memref<1x128xf32, #tpu.memory_space<vmem>>, vector<1x128xf32>
    %cst_26 = arith.constant dense<0.000000e+00> : vector<16x128xf32>
    %46 = tpu.matmul %43, %2, %cst_26 {dimension_numbers = #tpu.dot_dimension_numbers<[1], [0], [0], [1], [0, 0, 1, 1], [], []>} : vector<16x128xf32>, vector<128x128xf32>, vector<16x128xf32> -> vector<16x128xf32>
    %cst_27 = arith.constant dense<0.000000e+00> : vector<128xf32>
    %47 = vector.multi_reduction <add>, %46, %cst_27 [0] : vector<16x128xf32> to vector<128xf32>
    %48 = vector.shape_cast %47 : vector<128xf32> to vector<1x128xf32>
    %cst_28 = arith.constant 3.906250e-03 : f32
    %49 = vector.broadcast %cst_28 : f32 to vector<1x128xf32>
    %50 = arith.mulf %48, %49 : vector<1x128xf32>
    %51 = vector.broadcast %50 : vector<1x128xf32> to vector<16x128xf32>
    %52 = arith.subf %43, %51 : vector<16x128xf32>
    %53 = arith.mulf %52, %52 : vector<16x128xf32>
    %cst_29 = arith.constant dense<0.000000e+00> : vector<16x128xf32>
    %54 = tpu.matmul %53, %2, %cst_29 {dimension_numbers = #tpu.dot_dimension_numbers<[1], [0], [0], [1], [0, 0, 1, 1], [], []>} : vector<16x128xf32>, vector<128x128xf32>, vector<16x128xf32> -> vector<16x128xf32>
    %cst_30 = arith.constant dense<0.000000e+00> : vector<128xf32>
    %55 = vector.multi_reduction <add>, %54, %cst_30 [0] : vector<16x128xf32> to vector<128xf32>
    %56 = vector.shape_cast %55 : vector<128xf32> to vector<1x128xf32>
    %cst_31 = arith.constant 3.906250e-03 : f32
    %57 = vector.broadcast %cst_31 : f32 to vector<1x128xf32>
    %58 = arith.mulf %56, %57 : vector<1x128xf32>
    %cst_32 = arith.constant 9.99999974E-6 : f32
    %59 = vector.broadcast %cst_32 : f32 to vector<1x128xf32>
    %60 = arith.addf %58, %59 : vector<1x128xf32>
    %61 = math.rsqrt %60 : vector<1x128xf32>
    %62 = vector.broadcast %61 : vector<1x128xf32> to vector<16x128xf32>
    %63 = arith.mulf %52, %62 : vector<16x128xf32>
    %64 = vector.broadcast %44 : vector<1x128xf32> to vector<16x128xf32>
    %65 = arith.mulf %63, %64 : vector<16x128xf32>
    %66 = vector.broadcast %45 : vector<1x128xf32> to vector<16x128xf32>
    %67 = arith.addf %65, %66 : vector<16x128xf32>
    %68 = arith.addf %67, %1 : vector<16x128xf32>
    %c0_33 = arith.constant 0 : index
    %c0_34 = arith.constant 0 : index
    %c0_35 = arith.constant 0 : index
    %69 = vector.load %arg9[%c0_33, %c0_34, %c0_35] : memref<1x16x128xf32, #tpu.memory_space<vmem>>, vector<1x16x128xf32>
    %70 = vector.shape_cast %69 : vector<1x16x128xf32> to vector<16x128xf32>
    %71 = vector.shape_cast %68 : vector<16x128xf32> to vector<1x16x128xf32>
    tpu.vector_store %arg9[%c0_33, %c0_34, %c0_35], %71 {strides = array<i32>} : memref<1x16x128xf32, #tpu.memory_space<vmem>>, vector<1x16x128xf32>,
    return
  }
  func.func @transform_0(%arg0: i32) -> (i32, i32, i32) {
    %c0_i32 = arith.constant 0 : i32
    %c0_i32_0 = arith.constant 0 : i32
    %c0_i32_1 = arith.constant 0 : i32
    return %arg0, %c0_i32, %c0_i32_0 : i32, i32, i32
  }
  func.func @transform_1(%arg0: i32) -> (i32, i32) {
    %c0_i32 = arith.constant 0 : i32
    %c0_i32_0 = arith.constant 0 : i32
    %c0_i32_1 = arith.constant 0 : i32
    return %c0_i32, %c0_i32_0 : i32, i32
  }
  func.func @transform_2(%arg0: i32) -> (i32, i32) {
    %c0_i32 = arith.constant 0 : i32
    %c0_i32_0 = arith.constant 0 : i32
    %c0_i32_1 = arith.constant 0 : i32
    return %c0_i32, %c0_i32_0 : i32, i32
  }
  func.func @transform_3(%arg0: i32) -> (i32, i32) {
    %c0_i32 = arith.constant 0 : i32
    %c0_i32_0 = arith.constant 0 : i32
    %c0_i32_1 = arith.constant 0 : i32
    return %c0_i32, %c0_i32_0 : i32, i32
  }
  func.func @transform_4(%arg0: i32) -> (i32, i32) {
    %c0_i32 = arith.constant 0 : i32
    %c0_i32_0 = arith.constant 0 : i32
    %c0_i32_1 = arith.constant 0 : i32
    return %c0_i32, %c0_i32_0 : i32, i32
  }
  func.func @transform_5(%arg0: i32) -> (i32, i32) {
    %c0_i32 = arith.constant 0 : i32
    %c0_i32_0 = arith.constant 0 : i32
    %c0_i32_1 = arith.constant 0 : i32
    return %c0_i32, %c0_i32_0 : i32, i32
  }
  func.func @transform_6(%arg0: i32) -> (i32, i32) {
    %c0_i32 = arith.constant 0 : i32
    %c0_i32_0 = arith.constant 0 : i32
    %c0_i32_1 = arith.constant 0 : i32
    return %c0_i32, %c0_i32_0 : i32, i32
  }
  func.func @transform_7(%arg0: i32) -> (i32, i32) {
    %c0_i32 = arith.constant 0 : i32
    %c0_i32_0 = arith.constant 0 : i32
    %c0_i32_1 = arith.constant 0 : i32
    return %c0_i32, %c0_i32_0 : i32, i32
  }
  func.func @transform_8(%arg0: i32) -> (i32, i32, i32) {
    %c0_i32 = arith.constant 0 : i32
    %c0_i32_0 = arith.constant 0 : i32
    %c0_i32_1 = arith.constant 0 : i32
    return %arg0, %c0_i32, %c0_i32_0 : i32, i32, i32
  }
}

</mosaic_0001>

<bundles_post_ra>
// kernel: tpu_custom_call.1
= control target key start
LH: loop header
LB: loop body
LE: loop exit
PB: predicated region body
PF: predicated region fallthrough
CT: control target
= control target key end

     0   :  { %13 = vsyncpa [#allocation3], 0  ;;  %s2737_s0 = inlined_call_operand.hbm [shape: f32[2,16,128], index: 0, kind: input, shape index: {}]   ;;  %s2738_s1 = inlined_call_operand.hbm [shape: f32[384,128], index: 1, kind: input, shape index: {}]   ;;  %s2739_s2 = inlined_call_operand.hbm [shape: f32[384,128], index: 2, kind: input, shape index: {}]   ;;  %s2740_s3 = inlined_call_operand.hbm [shape: f32[128,128], index: 3, kind: input, shape index: {}]   ;;  %s2741_s4 = inlined_call_operand.vmem [shape: f32[1,128], index: 4, kind: input, shape index: {}]   ;;  %s2742_s5 = inlined_call_operand.vmem [shape: f32[1,128], index: 5, kind: input, shape index: {}]   ;;  %s2743_s6 = inlined_call_operand.vmem [shape: f32[1,128], index: 6, kind: input, shape index: {}]   ;;  %s2744_s7 = inlined_call_operand.vmem [shape: f32[1,128], index: 7, kind: input, shape index: {}]   ;;  %s2745_s8 = inlined_call_operand.hbm [shape: f32[2,16,128], index: 8, kind: output, shape index: {}]  }
   0x1   :  { %15 = vsyncpa [#allocation3 + $0x1], 0 }
   0x2   :  { %16 = vsyncpa [#allocation6], 0 }
   0x3   :  { %17 = vsyncpa [#allocation9], 0 }
   0x4   :  { %18 = vsyncpa [#allocation4], 0 }
   0x5   :  { %20 = vsyncpa [#allocation4 + $0x1], 0  ;;  %s2329_s27 = smov 0   ;;  %s2331_s28 = smov 0  }
   0x6   :  { %s2333_s29 = smov 0   ;;  %s2335_s30 = smov 0  }
   0x7 LB: > { %2751 = sst [smem:[#allocation15_spill]] %s2261_s27  ;;  %s2350_s9 = sadd.s32 4294967295, %s2273_s30   ;;  %s2273_s30 = sphi %s2335_s30, %s2776_s30   ;;  %s2269_s29 = sphi %s2333_s29, %s2775_s29   ;;  %s2265_s28 = sphi %s2331_s28, %s2774_s28   ;;  %s2261_s27 = sphi %s2329_s27, %s2773_s27  }
   0x8   : > { %s1318_s10 = sadd.s32 4294967294, %s2273_s30   ;;  %p46_p0 = scmp.ne.s32.totalorder %s2265_s28, %s2261_s27 }
   0x9   : > { %p2746_p1 = scmp.eq.s32.totalorder %s2350_s9, 0  ;;  %p223_p3 = scmp.eq.s32.totalorder %s1318_s10, 1 }
   0xa   : > { %p1319_p5 = scmp.ge.s32.totalorder %s2273_s30, 1  ;;  %p230_p7 = scmp.lt.s32.totalorder %s2273_s30, 3 }
   0xb   : > { %p2359_p4 = por %p2746_p1, %p46_p0  ;;  %p2364_p6 = por %p223_p3, %p46_p0 }
   0xc   : > { %p2369_p8 = pnand %p1319_p5, %p230_p7  ;;  %s2275_s14 = smov [#allocation5]  }
   0xd   : > { %s2752_s11 = scalar_select %p2359_p4, 1, 0 }
   0xe   : > { %s2753_s12 = scalar_select %p2364_p6, 1, 0 }
   0xf   : > { %s2755_s13 = scalar_select %p2369_p8, 1, 0 }
  0x10   : > { %2754 = sst [smem:[#allocation16_spill]] %s2753_s12  ;;  %s242_s15 = sshll.u32 %s2275_s14, 4  ;;  %s2373_s15 = int_to_ptr.vmem [resolvable:$true] %s242_s15 }
  0x11   : > { %p2016_p9 = pneg %p2369_p8  ;;  %s2276_s17 = smov [#allocation7]  }
  0x12   : > { %s255_s18 = sshll.u32 %s2276_s17, 4  ;;  %s2277_s19 = smov [#allocation8]   ;;  %s2384_s18 = int_to_ptr.vmem [resolvable:$true] %s255_s18 }
  0x13   : > { %p2380_p11 = pnand %p2016_p9, %p2746_p1  ;;  %s2386_s20 = sshll.u32 %s2277_s19, 4  ;;  %s269_s20 = int_to_ptr.vmem [resolvable:$true] %s2386_s20 }
  0x14   : > { %s2085_s23 = scalar_lea.hbm %s2738_s1, 6144 }
  0x15   : > { %p2086_p12 = scmp.ne.s32.totalorder %s2738_s1, %s2085_s23  ;;  %p2396_p13 = pneg %p2380_p11 }
  0x16   : > { %p2092_p5 = scmp.lt.u32.totalorder %s2085_s23, %s2738_s1 }
  0x17   : > { %p2088_p0 = pnand %p2396_p13, %p2086_p12 }
  0x19   : > { %p2089_p3 = pneg %p2088_p0 }
  0x1b   : > { %p2094_p7 = pnand %p2092_p5, %p2089_p3 }
  0x1d   : > { %2097 = shalt.err (!%p2094_p7)
}
  0x1e   : > { %s2098_s17 = scalar_lea.vmem %s2373_s15, 6144  ;;  %p2106_p2 = scmp.lt.s32.totalorder %s2373_s15, %s2373_s15 }
  0x1f   : > { %p2099_p9 = scmp.ne.s32.totalorder %s2373_s15, %s2098_s17  ;;  %p2107_p6 = scmp.lt.s32.totalorder %s2098_s17, %s2098_s17 }
  0x21   : > { %p2101_p10 = pnand %p2099_p9, %p2396_p13  ;;  %p2108_p12 = por %p2107_p6, %p2106_p2 }
  0x23   : > { %p2102_p1 = pneg %p2101_p10 }
  0x25   : > { %p2109_p0 = pnand %p2108_p12, %p2102_p1 }
  0x27   : > { %2112 = shalt.err (!%p2109_p0)
}
  0x28   : > { %s2278_s19 = smov 128   ;;  %s2279_s21 = smov 8  }
  0x29   : > { %2019 = dma.hbm_to_vmem [thread:$0]  (!%p2380_p11), %s2738_s1, 6144, %s2373_s15, [#allocation6], %s2278_s19, %s2278_s19, %s2279_s21  }
  0x2a   : > { %s2113_s10 = scalar_lea.hbm %s2739_s2, 6144 }
  0x2b   : > { %p2114_p1 = scmp.ne.s32.totalorder %s2739_s2, %s2113_s10  ;;  %p2120_p10 = scmp.lt.u32.totalorder %s2113_s10, %s2739_s2 }
  0x2d   : > { %p2116_p2 = pnand %p2114_p1, %p2396_p13 }
  0x2f   : > { %p2117_p6 = pneg %p2116_p2 }
  0x31   : > { %p2122_p3 = pnand %p2120_p10, %p2117_p6 }
  0x33   : > { %2125 = shalt.err (!%p2122_p3)
}
  0x34   : > { %s2126_s15 = scalar_lea.vmem %s2384_s18, 6144  ;;  %p2134_p12 = scmp.lt.s32.totalorder %s2384_s18, %s2384_s18 }
  0x35   : > { %p2127_p5 = scmp.ne.s32.totalorder %s2384_s18, %s2126_s15  ;;  %p2135_p0 = scmp.lt.s32.totalorder %s2126_s15, %s2126_s15 }
  0x37   : > { %p2129_p7 = pnand %p2127_p5, %p2396_p13  ;;  %p2136_p1 = por %p2135_p0, %p2134_p12 }
  0x39   : > { %p2130_p9 = pneg %p2129_p7 }
  0x3b   : > { %p2137_p2 = pnand %p2136_p1, %p2130_p9 }
  0x3d   : > { %2140 = shalt.err (!%p2137_p2)
}
  0x3e   : > { %2022 = dma.hbm_to_vmem [thread:$0]  (!%p2380_p11), %s2739_s2, 6144, %s2384_s18, [#allocation6], %s2278_s19, %s2278_s19, %s2279_s21  }
  0x3f   : > { %s2141_s24 = scalar_lea.hbm %s2740_s3, 2048 }
  0x40   : > { %p2142_p6 = scmp.ne.s32.totalorder %s2740_s3, %s2141_s24  ;;  %p2148_p5 = scmp.lt.u32.totalorder %s2141_s24, %s2740_s3 }
  0x42   : > { %p2144_p10 = pnand %p2142_p6, %p2396_p13 }
  0x44   : > { %p2145_p3 = pneg %p2144_p10 }
  0x46   : > { %p2150_p7 = pnand %p2148_p5, %p2145_p3 }
  0x48   : > { %2153 = shalt.err (!%p2150_p7)
}
  0x49   : > { %s2154_s15 = scalar_lea.vmem %s269_s20, 2048  ;;  %p2162_p1 = scmp.lt.s32.totalorder %s269_s20, %s269_s20 }
  0x4a   : > { %p2155_p9 = scmp.ne.s32.totalorder %s269_s20, %s2154_s15  ;;  %p2163_p2 = scmp.lt.s32.totalorder %s2154_s15, %s2154_s15 }
  0x4c   : > { %p2157_p12 = pnand %p2155_p9, %p2396_p13  ;;  %p2164_p4 = por %p2163_p2, %p2162_p1 }
  0x4e   : > { %p2158_p0 = pneg %p2157_p12 }
  0x50   : > { %p2165_p8 = pnand %p2164_p4, %p2158_p0 }
  0x52   : > { %2168 = shalt.err (!%p2165_p8)
}
  0x53   : > { %2025 = dma.hbm_to_vmem [thread:$0]  (!%p2380_p11), %s2740_s3, 2048, %s269_s20, [#allocation9], %s2278_s19, %s2278_s19, %s2279_s21  }
  0x54   : > { %s2469_s26 = sadd.s32 1, %s2273_s30   ;;  %s33_s12 = sadd.s32 1, %s2269_s29 }
  0x55   : > { %s30_s16 = ssub.s32 %s2273_s30, %s2469_s26  ;;  %p40_p8 = scmp.ne.s32.totalorder %s2269_s29, %s2265_s28 }
  0x56   : > { %p31_p4 = scmp.eq.s32.totalorder %s30_s16, 0  ;;  %p41_p13 = scmp.eq.s32.totalorder %s2273_s30, 0 }
  0x57   : > { %p2037_p6 = scmp.lt.s32.totalorder %s2273_s30, 2  ;;  %p2758_p3 = scmp.eq.s32.totalorder %s2350_s9, 1 }
  0x58   : > { %s2479_s22 = scalar_select %p31_p4, %s2269_s29, %s33_s12  }
  0x59   : > { %p42_p10 = por %p41_p13, %p40_p8  ;;  %p2483_p5 = por %p2758_p3, %p40_p8 }
  0x5a   : > { %s294_s24 = sand.u32 1, %s2269_s29   ;;  %s1348_s25 = sshll.u32 %s2273_s30, 8 }
  0x5b   : > { %s1324_s20 = sshll.u32 %s294_s24, 4  ;;  %s2492_s17 = scalar_lea.hbm %s2737_s0, %s1348_s25 }
  0x5c   : > { %s298_s15 = scalar_lea.vmem [#allocation2], %s1324_s20  ;;  %p2494_p11 = pnand %p2037_p6, %p42_p10 }
  0x5d   : > { %s305_s18 = sshll.u32 %s298_s15, 4  ;;  %s2500_s16 = scalar_lea.sflag [#allocation3], %s294_s24  ;;  %s2498_s18 = int_to_ptr.vmem [resolvable:$true] %s305_s18 }
  0x5e   : > { %s2169_s12 = scalar_lea.hbm %s2492_s17, 256  ;;  %p2171_p9 = pneg %p2494_p11 }
  0x5f   : > { %p2170_p7 = scmp.ne.s32.totalorder %s2492_s17, %s2169_s12  ;;  %s2174_s10 = scalar_lea.hbm %s2737_s0, 512 }
  0x60   : > { %p2175_p1 = scmp.lt.u32.totalorder %s2492_s17, %s2737_s0  ;;  %p2176_p2 = scmp.lt.u32.totalorder %s2174_s10, %s2169_s12 }
  0x61   : > { %p2172_p12 = pnand %p2171_p9, %p2170_p7  ;;  %p2178_p8 = scmp.lt.u32.totalorder %s2169_s12, %s2492_s17 }
  0x62   : > { %p2177_p4 = por %p2176_p2, %p2175_p1 }
  0x63   : > { %p2173_p0 = pneg %p2172_p12 }
  0x64   : > { %p2179_p13 = por %p2178_p8, %p2177_p4 }
  0x66   : > { %p2180_p6 = pnand %p2179_p13, %p2173_p0 }
  0x68   : > { %2183 = shalt.err (!%p2180_p6)
}
  0x69   : > { %s2184_s24 = scalar_lea.vmem %s2498_s18, 256  ;;  %s2280_s25 = smov [#allocation2]  }
  0x6a   : > { %p2185_p10 = scmp.ne.s32.totalorder %s2498_s18, %s2184_s24  ;;  %s2189_s20 = sshll.u32 %s2280_s25, 4  ;;  %s2190_s20 = int_to_ptr.vmem [resolvable:$false] %s2189_s20 }
  0x6b   : > { %s2191_s14 = scalar_lea.vmem %s2190_s20, 512  ;;  %p2192_p12 = scmp.lt.s32.totalorder %s2498_s18, %s2190_s20 }
  0x6c   : > { %p2187_p3 = pnand %p2185_p10, %p2171_p9  ;;  %p2193_p1 = scmp.lt.s32.totalorder %s2191_s14, %s2184_s24 }
  0x6e   : > { %p2188_p7 = pneg %p2187_p3  ;;  %p2194_p2 = por %p2193_p1, %p2192_p12 }
  0x70   : > { %p2195_p4 = pnand %p2194_p2, %p2188_p7 }
  0x72   : > { %2198 = shalt.err (!%p2195_p4)
}
  0x73   : > { %2029 = dma.hbm_to_vmem [thread:$0]  (!%p2494_p11), %s2492_s17, 256, %s2498_s18, %s2500_s16, %s2278_s19, %s2278_s19, %s2279_s21  }
  0x74   : > { %p2761_p9 = scmp.ne.s32.totalorder %s2755_s13, 0 }
  0x75   : > { %s2534_s12 = sand.u32 (!%p2761_p9), 1, %s2265_s28   ;;  %p2762_p0 = scmp.ne.s32.totalorder (!%p2761_p9), %s2752_s11, 0 }
  0x76   : > { %317 = sbr.rel (%p2761_p9) target bundleno = 1595 (0x63b), region = 52  ;;  %s1328_s10 = sshll.u32 (!%p2761_p9), %s2534_s12, 4 }
  0x77   : > { %s320_s15 = scalar_lea.sflag (!%p2761_p9), [#allocation3], %s2534_s12  ;;  %s2540_s27 = scalar_lea.vmem (!%p2761_p9), [#allocation2], %s1328_s10 }
  0x7d   : > { %2244 = dma.done.wait (%p2762_p0), %s320_s15, 256  }
  0x7e   : > { %2246 = vsyncadd (%p2762_p0), %s320_s15, 4294967040  ;;  %p2763_p11 = scmp.eq.s32.totalorder %s2350_s9, 0 }
  0x80   : > { %2248 = dma.done.wait (%p2763_p11), [#allocation6], 12288   ;;  %p2764_p8 = pmov %p2763_p11 }
  0x82   : > { %2250 = vsyncadd (%p2764_p8), [#allocation6], 4294955008  ;;  %p2765_p13 = pmov %p2764_p8 }
  0x83   : > { %p2766_p6 = pmov %p2764_p8 }
  0x84   : > { %2252 = dma.done.wait (%p2765_p13), [#allocation9], 2048  }
  0x85   : > { %2254 = vsyncadd (%p2766_p6), [#allocation9], 4294965248  ;;  %v418_v0 = vld [vmem:[#allocation5 + $0x80] sm:$0xff]  ;;  %v419_v1 = vld [vmem:[#allocation5 + $0x88] sm:$0xff]  ;;  %vm395_vm0 = vcmask 1046528   ;;  %vm388_vm1 = vcmask 1040384  }
  0x86   : > { %v402_v2 = vld [vmem:[#allocation5] sm:$0xff]  ;;  %v1744_v3 = vpack.c.bf16 %v419_v1, %v418_v0  ;;  %v403_v4 = vld [vmem:[#allocation5 + $0x8] sm:$0xff]  ;;  %v420_v9 = vld [vmem:[#allocation5 + $0x90] sm:$0xff]  ;;  %s1349_s25 = sshll.u32 %s2350_s9, 8  ;;  %s367_s20 = scalar_lea.vmem [#allocation10], %s1328_s10 }
  0x87   : > { %v434_v5 = vld [vmem:[#allocation5 + $0x100] sm:$0xff]  ;;  %v435_v6 = vld [vmem:[#allocation5 + $0x108] sm:$0xff]  ;;  %v1746_v7 = vpack.c.bf16 %v403_v4, %v402_v2  ;;  %v421_v10 = vld [vmem:[#allocation5 + $0x98] sm:$0xff]  ;;  %s1216_s14 = sshll.u32 %s367_s20, 4  ;;  %s2689_s11 = scalar_lea.hbm %s2745_s8, %s1349_s25  ;;  %s2691_s14 = int_to_ptr.vmem [resolvable:$true] %s1216_s14 }
  0x88   : > { %v1776_v8 = vpack.c.bf16 %v435_v6, %v434_v5  ;;  %v404_v11 = vld [vmem:[#allocation5 + $0x10] sm:$0xff]  ;;  %1745 = vmatprep.subr.bf16.mxu0 %v1744_v3  ;;  %v1748_v12 = vpack.c.bf16 %v421_v10, %v420_v9  ;;  %v405_v13 = vld [vmem:[#allocation5 + $0x18] sm:$0xff]  ;;  %v422_v18 = vld [vmem:[#allocation5 + $0xa0] sm:$0xff]  ;;  %s1203_s9 = scalar_lea.sflag [#allocation4], %s2534_s12  ;;  %s2199_s10 = scalar_lea.vmem %s2691_s14, 256 }
  0x89   : > { %v436_v14 = vld [vmem:[#allocation5 + $0x110] sm:$0xff]  ;;  %v437_v15 = vld [vmem:[#allocation5 + $0x118] sm:$0xff]  ;;  %1747 = vmatpush3.bf16.msra.mxu0 %v1746_v7  ;;  %v1750_v16 = vpack.c.bf16 %v405_v13, %v404_v11  ;;  %v423_v19 = vld [vmem:[#allocation5 + $0xa8] sm:$0xff]  ;;  %p2200_p10 = scmp.ne.s32.totalorder %s2691_s14, %s2199_s10  ;;  %s2281_s13 = smov [#allocation10]  }
  0x8a   : > { %1777 = vmatprep.subr.bf16.mxu1 %v1776_v8  ;;  %v1780_v17 = vpack.c.bf16 %v437_v15, %v436_v14  ;;  %v406_v20 = vld [vmem:[#allocation5 + $0x20] sm:$0xff]  ;;  %1749 = vmatprep.subr.bf16.mxu0 %v1748_v12  ;;  %v1752_v21 = vpack.c.bf16 %v423_v19, %v422_v18  ;;  %v407_v22 = vld [vmem:[#allocation5 + $0x28] sm:$0xff]  ;;  %v424_v26 = vld [vmem:[#allocation5 + $0xb0] sm:$0xff]  ;;  %s2203_s19 = sshll.u32 %s2281_s13, 4  ;;  %s2204_s19 = int_to_ptr.vmem [resolvable:$false] %s2203_s19 }
  0x8b   : > { %1779 = vmatpush3.bf16.msra.mxu1 %v1776_v8  ;;  %v438_v23 = vld [vmem:[#allocation5 + $0x120] sm:$0xff]  ;;  %v439_v24 = vld [vmem:[#allocation5 + $0x128] sm:$0xff]  ;;  %v425_v27 = vld [vmem:[#allocation5 + $0xb8] sm:$0xff]  ;;  %v1754_v30 = vpack.c.bf16 %v407_v22, %v406_v20  ;;  %p2201_p3 = pnand %p2200_p10, %p2483_p5  ;;  %s2205_s21 = scalar_lea.vmem %s2204_s19, 512 }
  0x8c   : > { %1781 = vmatprep.subr.bf16.mxu1 %v1780_v17  ;;  %v1784_v25 = vpack.c.bf16 %v439_v24, %v438_v23  ;;  %v440_v28 = vld [vmem:[#allocation5 + $0x130] sm:$0xff]  ;;  %v441_v29 = vld [vmem:[#allocation5 + $0x138] sm:$0xff]  ;;  %v1756_v31 = vpack.c.bf16 %v425_v27, %v424_v26  ;;  %v426_v35 = vld [vmem:[#allocation5 + $0xc0] sm:$0xff]  ;;  %p2206_p12 = scmp.lt.s32.totalorder %s2691_s14, %s2204_s19  ;;  %p2207_p1 = scmp.lt.s32.totalorder %s2205_s21, %s2199_s10 }
  0x8d   : > { %1751 = vmatpush3.bf16.msra.mxu0 %v1750_v16  ;;  %v408_v32 = vld [vmem:[#allocation5 + $0x30] sm:$0xff]  ;;  %v409_v33 = vld [vmem:[#allocation5 + $0x38] sm:$0xff]  ;;  %v1788_v34 = vpack.c.bf16 %v441_v29, %v440_v28  ;;  %v427_v36 = vld [vmem:[#allocation5 + $0xc8] sm:$0xff]  ;;  %p2202_p7 = pneg %p2201_p3 }
  0x8e   : > { %1753 = vmatprep.subr.bf16.mxu0 %v1752_v21  ;;  %v442_v37 = vld [vmem:[#allocation5 + $0x140] sm:$0xff]  ;;  %v443_v38 = vld [vmem:[#allocation5 + $0x148] sm:$0xff]  ;;  %v1758_v39 = vpack.c.bf16 %v409_v33, %v408_v32  ;;  %v1760_v40 = vpack.c.bf16 %v427_v36, %v426_v35  ;;  %v428_v44 = vld [vmem:[#allocation5 + $0xd0] sm:$0xff]  ;;  %p2208_p2 = por %p2207_p1, %p2206_p12 }
  0x8f   : > { %1783 = vmatpush3.bf16.msra.mxu1 %v1780_v17  ;;  %v410_v41 = vld [vmem:[#allocation5 + $0x40] sm:$0xff]  ;;  %v411_v42 = vld [vmem:[#allocation5 + $0x48] sm:$0xff]  ;;  %v1792_v43 = vpack.c.bf16 %v443_v38, %v442_v37  ;;  %v429_v45 = vld [vmem:[#allocation5 + $0xd8] sm:$0xff] }
  0x90   : > { %1785 = vmatprep.subr.bf16.mxu1 %v1784_v25  ;;  %v444_v46 = vld [vmem:[#allocation5 + $0x150] sm:$0xff]  ;;  %v445_v47 = vld [vmem:[#allocation5 + $0x158] sm:$0xff]  ;;  %v1762_v48 = vpack.c.bf16 %v411_v42, %v410_v41  ;;  %v1764_v51 = vpack.c.bf16 %v429_v45, %v428_v44  ;;  %v430_v57 = vld [vmem:[#allocation5 + $0xe0] sm:$0xff]  ;;  %p2209_p4 = pnand %p2208_p2, %p2202_p7 }
  0x91   : > { %1755 = vmatpush3.bf16.msra.mxu0 %v1754_v30  ;;  %v2555_v49 = vld [vmem:[%s2540_s27] sm:$0xff]  ;;  %v2558_v50 = vld [vmem:[%s2540_s27 + $0x8] sm:$0xff]  ;;  %v1796_v56 = vpack.c.bf16 %v445_v47, %v444_v46  ;;  %vm2568_vm2 = vmneg %vm388_vm1 }
  0x92   : > { %1757 = vmatprep.subr.bf16.mxu0 %v1756_v31  ;;  %v412_v52 = vld [vmem:[#allocation5 + $0x50] sm:$0xff]  ;;  %v413_v53 = vld [vmem:[#allocation5 + $0x58] sm:$0xff]  ;;  %v396_v54 = vrot.slane %v2555_v49, 1  ;;  %v397_v55 = vrot.slane %v2558_v50, 1  ;;  %v431_v58 = vld [vmem:[#allocation5 + $0xe8] sm:$0xff]  ;;  %514 = vmatprep.mubr.f32.mxu0 %v2555_v49  ;;  %v389_v16 = vrot.slane %v2555_v49, 7 }
  0x93   : > { %1787 = vmatpush3.bf16.msra.mxu1 %v1784_v25  ;;  %v446_v59 = vld [vmem:[#allocation5 + $0x160] sm:$0xff]  ;;  %v447_v60 = vld [vmem:[#allocation5 + $0x168] sm:$0xff]  ;;  %v1766_v62 = vpack.c.bf16 %v413_v53, %v412_v52  ;;  %v1768_v63 = vpack.c.bf16 %v431_v58, %v430_v57  ;;  %v432_v3 = vld [vmem:[#allocation5 + $0xf0] sm:$0xff]  ;;  %v390_v20 = vrot.slane %v2558_v50, 7 }
  0x94   : > { %1789 = vmatprep.subr.bf16.mxu1 %v1788_v34  ;;  %v398_v61 = vsel %vm395_vm0, %v396_v54, %v397_v55  ;;  %v414_v0 = vld [vmem:[#allocation5 + $0x60] sm:$0xff]  ;;  %v415_v1 = vld [vmem:[#allocation5 + $0x68] sm:$0xff]  ;;  %v1800_v2 = vpack.c.bf16 %v447_v60, %v446_v59  ;;  %v433_v4 = vld [vmem:[#allocation5 + $0xf8] sm:$0xff] }
  0x95   : > { %1759 = vmatpush3.bf16.msra.mxu0 %v1758_v39  ;;  %1566 = vmatprep.mubr.f32.mxu1 %v398_v61  ;;  %v448_v5 = vld [vmem:[#allocation5 + $0x170] sm:$0xff]  ;;  %v449_v6 = vld [vmem:[#allocation5 + $0x178] sm:$0xff]  ;;  %v1770_v7 = vpack.c.bf16 %v415_v1, %v414_v0  ;;  %v1772_v8 = vpack.c.bf16 %v433_v4, %v432_v3  ;;  %v370_v12 = vld [vmem:[#allocation8] sm:$0xff]  ;;  %v391_v24 = vsel %vm388_vm1, %v389_v16, %v390_v20 }
  0x96   : > { %1761 = vmatprep.subr.bf16.mxu0 %v1760_v40  ;;  %v416_v9 = vld [vmem:[#allocation5 + $0x70] sm:$0xff]  ;;  %v417_v10 = vld [vmem:[#allocation5 + $0x78] sm:$0xff]  ;;  %v1804_v11 = vpack.c.bf16 %v449_v6, %v448_v5  ;;  %v371_v13 = vld [vmem:[#allocation8 + $0x8] sm:$0xff] }
  0x97   : > { %1791 = vmatpush3.bf16.msra.mxu1 %v1788_v34  ;;  %v1774_v14 = vpack.c.bf16 %v417_v10, %v416_v9  ;;  %v2564_v15 = vpack.c.bf16 %v371_v13, %v370_v12  ;;  %v372_v17 = vld [vmem:[#allocation8 + $0x10] sm:$0xff]  ;;  %v373_v18 = vld [vmem:[#allocation8 + $0x18] sm:$0xff]  ;;  %v374_v22 = vld [vmem:[#allocation8 + $0x20] sm:$0xff] }
  0x98   : > { %1793 = vmatprep.subr.bf16.mxu1 %v1792_v43  ;;  %v2574_v21 = vpack.c.bf16 %v373_v18, %v372_v17  ;;  %v375_v23 = vld [vmem:[#allocation8 + $0x28] sm:$0xff]  ;;  %v376_v26 = vld [vmem:[#allocation8 + $0x30] sm:$0xff]  ;;  %v377_v27 = vld [vmem:[#allocation8 + $0x38] sm:$0xff] }
  0x99   : > { %1763 = vmatpush3.bf16.msra.mxu0 %v1762_v48  ;;  %v2585_v25 = vpack.c.bf16 %v375_v23, %v374_v22  ;;  %v2591_v28 = vpack.c.bf16 %v377_v27, %v376_v26  ;;  %v378_v29 = vld [vmem:[#allocation8 + $0x40] sm:$0xff]  ;;  %v379_v30 = vld [vmem:[#allocation8 + $0x48] sm:$0xff]  ;;  %v380_v32 = vld [vmem:[#allocation8 + $0x50] sm:$0xff] }
  0x9a   : > { %1765 = vmatprep.subr.bf16.mxu0 %v1764_v51  ;;  %v2597_v31 = vpack.c.bf16 %v379_v30, %v378_v29  ;;  %v381_v33 = vld [vmem:[#allocation8 + $0x58] sm:$0xff]  ;;  %v382_v35 = vld [vmem:[#allocation8 + $0x60] sm:$0xff]  ;;  %v383_v36 = vld [vmem:[#allocation8 + $0x68] sm:$0xff] }
  0x9b   : > { %1795 = vmatpush3.bf16.msra.mxu1 %v1792_v43  ;;  %v2603_v34 = vpack.c.bf16 %v381_v33, %v380_v32  ;;  %v2612_v37 = vpack.c.bf16 %v383_v36, %v382_v35  ;;  %v384_v38 = vld [vmem:[#allocation8 + $0x70] sm:$0xff]  ;;  %v385_v39 = vld [vmem:[#allocation8 + $0x78] sm:$0xff]  ;;  %v824_v3 = vld [vmem:[#allocation7 + $0x80] sm:$0xff] }
  0x9c   : > { %1797 = vmatprep.subr.bf16.mxu1 %v1796_v56  ;;  %v2618_v40 = vpack.c.bf16 %v385_v39, %v384_v38  ;;  %v825_v4 = vld [vmem:[#allocation7 + $0x88] sm:$0xff]  ;;  %v808_v6 = vld [vmem:[#allocation7] sm:$0xff]  ;;  %v826_v12 = vld [vmem:[#allocation7 + $0x90] sm:$0xff] }
  0x9d   : > { %1767 = vmatpush3.bf16.msra.mxu0 %v1766_v62  ;;  %v1872_v5 = vpack.c.bf16 %v825_v4, %v824_v3  ;;  %v840_v9 = vld [vmem:[#allocation7 + $0x100] sm:$0xff]  ;;  %v841_v10 = vld [vmem:[#allocation7 + $0x108] sm:$0xff]  ;;  %v827_v13 = vld [vmem:[#allocation7 + $0x98] sm:$0xff] }
  0x9e   : > { %1769 = vmatprep.subr.bf16.mxu0 %v1768_v63  ;;  %v811_v17 = vld [vmem:[#allocation7 + $0x18] sm:$0xff]  ;;  %v842_v20 = vld [vmem:[#allocation7 + $0x110] sm:$0xff]  ;;  %v829_v26 = vld [vmem:[#allocation7 + $0xa8] sm:$0xff] }
  0x9f   : > { %1799 = vmatpush3.bf16.msra.mxu1 %v1796_v56  ;;  %v843_v22 = vld [vmem:[#allocation7 + $0x118] sm:$0xff]  ;;  %v812_v29 = vld [vmem:[#allocation7 + $0x20] sm:$0xff]  ;;  %v813_v30 = vld [vmem:[#allocation7 + $0x28] sm:$0xff] }
  0xa0   : > { %1801 = vmatprep.subr.bf16.mxu1 %v1800_v2  ;;  %v1908_v23 = vpack.c.bf16 %v843_v22, %v842_v20  ;;  %v1882_v32 = vpack.c.bf16 %v813_v30, %v812_v29  ;;  %v844_v33 = vld [vmem:[#allocation7 + $0x120] sm:$0xff]  ;;  %v845_v35 = vld [vmem:[#allocation7 + $0x128] sm:$0xff]  ;;  %v830_v38 = vld [vmem:[#allocation7 + $0xb0] sm:$0xff] }
  0xa1   : > { %1771 = vmatpush3.bf16.msra.mxu0 %v1770_v7  ;;  %v809_v7 = vld [vmem:[#allocation7 + $0x8] sm:$0xff]  ;;  %v1912_v36 = vpack.c.bf16 %v845_v35, %v844_v33  ;;  %v831_v39 = vld [vmem:[#allocation7 + $0xb8] sm:$0xff]  ;;  %v836_v4 = vld [vmem:[#allocation7 + $0xe0] sm:$0xff] }
  0xa2   : > { %1773 = vmatprep.subr.bf16.mxu0 %v1772_v8  ;;  %v1874_v8 = vpack.c.bf16 %v809_v7, %v808_v6  ;;  %v851_v3 = vld [vmem:[#allocation7 + $0x158] sm:$0xff]  ;;  %v837_v6 = vld [vmem:[#allocation7 + $0xe8] sm:$0xff]  ;;  %v822_v20 = vld [vmem:[#allocation7 + $0x70] sm:$0xff] }
  0xa3   : > { %1803 = vmatpush3.bf16.msra.mxu1 %v1800_v2  ;;  %v823_v22 = vld [vmem:[#allocation7 + $0x78] sm:$0xff] }
  0xa4   : > { %1805 = vmatprep.subr.bf16.mxu1 %v1804_v11 }
  0xa5   : > { %1775 = vmatpush3.bf16.msra.mxu0 %v1774_v14  ;;  %v1876_v14 = vpack.c.bf16 %v827_v13, %v826_v12  ;;  %v821_v12 = vld [vmem:[#allocation7 + $0x68] sm:$0xff]  ;;  %v838_v13 = vld [vmem:[#allocation7 + $0xf0] sm:$0xff] }
  0xa6   : > { %1809 = vmatprep.subr.bf16.mxu0 %v2564_v15 }
  0xa7   : > { %1807 = vmatpush3.bf16.msra.mxu1 %v1804_v11  ;;  %v1904_v11 = vpack.c.bf16 %v841_v10, %v840_v9  ;;  %v853_v9 = vld [vmem:[#allocation7 + $0x168] sm:$0xff]  ;;  %v1896_v10 = vpack.c.bf16 %v837_v6, %v836_v4 }
  0xa8   : > { %1841 = vmatprep.subr.bf16.mxu1 %v2564_v15  ;;  %1334 = vmatmul.mubr.msk.f32.vlgmr.msra.gmra.mrb[0].mxu0 %vm2568_vm2, %v389_v16  ;;  %v810_v16 = vld [vmem:[#allocation7 + $0x10] sm:$0xff] }
  0xa9   : > { %519 = vmatprep.mubr.f32.mxu0 %v2558_v50  ;;  %1811 = vmatpush3.bf16.msra.mxu0 %v2564_v15  ;;  %v1878_v18 = vpack.c.bf16 %v811_v17, %v810_v16 }
  0xaa   : > { %1567 = vmatmul.mubr.msk.f32.vlgmr.msra.gmra.mrb[0].mxu1 %vm395_vm0, %v397_v55  ;;  %1813 = vmatprep.subr.bf16.mxu0 %v2574_v21 }
  0xab   : > { %1843 = vmatpush3.bf16.msra.mxu1 %v2564_v15 }
  0xac   : > { %1845 = vmatprep.subr.bf16.mxu1 %v2574_v21  ;;  %520 = vmatmul.mubr.f32.gmra.mrb[2].mxu0 %v391_v24  ;;  %v828_v24 = vld [vmem:[#allocation7 + $0xa0] sm:$0xff] }
  0xad   : > { %1815 = vmatpush3.bf16.msra.mxu0 %v2574_v21  ;;  %v1880_v27 = vpack.c.bf16 %v829_v26, %v828_v24  ;;  %v854_v24 = vld [vmem:[#allocation7 + $0x170] sm:$0xff]  ;;  %v855_v26 = vld [vmem:[#allocation7 + $0x178] sm:$0xff] }
  0xae   : > { %1817 = vmatprep.subr.bf16.mxu0 %v2585_v25 }
  0xaf   : > { %1847 = vmatpush3.bf16.msra.mxu1 %v2574_v21 }
  0xb0   : > { %1849 = vmatprep.subr.bf16.mxu1 %v2585_v25 }
  0xb1   : > { %1819 = vmatpush3.bf16.msra.mxu0 %v2585_v25 }
  0xb2   : > { %1821 = vmatprep.subr.bf16.mxu0 %v2591_v28 }
  0xb3   : > { %1851 = vmatpush3.bf16.msra.mxu1 %v2585_v25 }
  0xb4   : > { %1853 = vmatprep.subr.bf16.mxu1 %v2591_v28 }
  0xb5   : > { %1823 = vmatpush3.bf16.msra.mxu0 %v2591_v28 }
  0xb6   : > { %1825 = vmatprep.subr.bf16.mxu0 %v2597_v31 }
  0xb7   : > { %1855 = vmatpush3.bf16.msra.mxu1 %v2591_v28 }
  0xb8   : > { %1857 = vmatprep.subr.bf16.mxu1 %v2597_v31 }
  0xb9   : > { %1827 = vmatpush3.bf16.msra.mxu0 %v2597_v31 }
  0xba   : > { %1829 = vmatprep.subr.bf16.mxu0 %v2603_v34 }
  0xbb   : > { %1859 = vmatpush3.bf16.msra.mxu1 %v2597_v31 }
  0xbc   : > { %1861 = vmatprep.subr.bf16.mxu1 %v2603_v34 }
  0xbd   : > { %1831 = vmatpush3.bf16.msra.mxu0 %v2603_v34 }
  0xbe   : > { %1833 = vmatprep.subr.bf16.mxu0 %v2612_v37 }
  0xbf   : > { %1863 = vmatpush3.bf16.msra.mxu1 %v2603_v34 }
  0xc0   : > { %1865 = vmatprep.subr.bf16.mxu1 %v2612_v37 }
  0xc1   : > { %1835 = vmatpush3.bf16.msra.mxu0 %v2612_v37 }
  0xc2   : > { %1837 = vmatprep.subr.bf16.mxu0 %v2618_v40 }
  0xc3   : > { %1867 = vmatpush3.bf16.msra.mxu1 %v2612_v37 }
  0xc4   : > { %1869 = vmatprep.subr.bf16.mxu1 %v2618_v40 }
  0xc5   : > { %1839 = vmatpush3.bf16.msra.mxu0 %v2618_v40 }
  0xc6   : > { %1873 = vmatprep.subr.bf16.mxu0 %v1872_v5 }
  0xc7   : > { %1871 = vmatpush3.bf16.msra.mxu1 %v2618_v40 }
  0xc8   : > { %1905 = vmatprep.subr.bf16.mxu1 %v1904_v11 }
 0x17b   : > { %v1382_v41 = vpop.f32.mrb[0].mxu0 }
 0x17c   : > { %v1383_v42 = vpop.f32.mrb[1].mxu0 }
 0x17d   : > { %v1568_v43 = vpop.f32.mrb[0].mxu1  ;;  %v1384_v44 = vadd.f32 %v1383_v42, %v1382_v41  ;;  %v1884_v41 = vpack.c.bf16 %v831_v39, %v830_v38  ;;  %v814_v42 = vld [vmem:[#allocation7 + $0x30] sm:$0xff] }
 0x17e   : > { %v591_v45 = vpop.f32.mrb[1].mxu1 }
 0x17f   : > { %v592_v46 = vadd.f32 %v1384_v44, %v591_v45  ;;  %v1385_v47 = vpop.f32.mrb[2].mxu0  ;;  %v846_v45 = vld [vmem:[#allocation7 + $0x130] sm:$0xff] }
 0x180   : > { %v1386_v48 = vpop.f32.mrb[3].mxu0 }
 0x181   : > { %v1387_v51 = vadd.f32 %v1386_v48, %v1385_v47  ;;  %1601 = vmatprep.mubr.f32.mxu0 %v592_v46  ;;  %v832_v47 = vld [vmem:[#allocation7 + $0xc0] sm:$0xff] }
 0x183   : > { %v597_v52 = vadd.f32 %v1568_v43, %v1387_v51  ;;  %v815_v43 = vld [vmem:[#allocation7 + $0x38] sm:$0xff]  ;;  %v833_v51 = vld [vmem:[#allocation7 + $0xc8] sm:$0xff] }
 0x184   : > { %v1886_v44 = vpack.c.bf16 %v815_v43, %v814_v42 }
 0x185   : > { %1602 = vmatmul.mubr.f32.vlgmr.msra.gmra.mrb[4].mxu0 %v597_v52 }
 0x186   : > { %1875 = vmatpush3.bf16.msra.mxu0 %v1874_v8  ;;  %v852_v8 = vld [vmem:[#allocation7 + $0x160] sm:$0xff] }
 0x187   : > { %1877 = vmatprep.subr.bf16.mxu0 %v1876_v14  ;;  %v839_v14 = vld [vmem:[#allocation7 + $0xf8] sm:$0xff]  ;;  %v1928_v16 = vpack.c.bf16 %v853_v9, %v852_v8 }
 0x18a   : > { %1879 = vmatpush3.bf16.msra.mxu0 %v1878_v18  ;;  %v1900_v18 = vpack.c.bf16 %v839_v14, %v838_v13 }
 0x18b   : > { %1881 = vmatprep.subr.bf16.mxu0 %v1880_v27  ;;  %v1932_v27 = vpack.c.bf16 %v855_v26, %v854_v24 }
 0x18e   : > { %1883 = vmatpush3.bf16.msra.mxu0 %v1882_v32 }
 0x18f   : > { %1885 = vmatprep.subr.bf16.mxu0 %v1884_v41 }
 0x192   : > { %1887 = vmatpush3.bf16.msra.mxu0 %v1886_v44 }
 0x258   : > { %v1603_v53 = vpop.f32.mrb[4].mxu0 }
 0x259   : > { %v668_v54 = vpop.f32.mrb[5].mxu0 }
 0x25a   : > { %v677_v55 = vadd.f32 %v1603_v53, %v668_v54  ;;  %v817_v53 = vld [vmem:[#allocation7 + $0x48] sm:$0xff]  ;;  %v1888_v54 = vpack.c.bf16 %v833_v51, %v832_v47 }
 0x25c   : > { %v678_v56 = vrot.slane %v677_v55, 4  ;;  %1889 = vmatprep.subr.bf16.mxu0 %v1888_v54 }
 0x25e   : > { %v679_v57 = vadd.f32 %v678_v56, %v677_v55  ;;  %v848_v56 = vld [vmem:[#allocation7 + $0x140] sm:$0xff] }
 0x260   : > { %v680_v58 = vrot.slane %v679_v57, 2 }
 0x262   : > { %v681_v59 = vadd.f32 %v680_v58, %v679_v57  ;;  %v849_v57 = vld [vmem:[#allocation7 + $0x148] sm:$0xff]  ;;  %v834_v58 = vld [vmem:[#allocation7 + $0xd0] sm:$0xff] }
 0x264   : > { %v682_v60 = vrot.slane %v681_v59, 1 }
 0x266   : > { %v683_v61 = vadd.f32 %v682_v60, %v681_v59  ;;  %v1920_v59 = vpack.c.bf16 %v849_v57, %v848_v56  ;;  %v835_v60 = vld [vmem:[#allocation7 + $0xd8] sm:$0xff] }
 0x268   : > { %v684_v62 = vmul.f32 0.00390625, %v683_v61  ;;  %v818_v61 = vld [vmem:[#allocation7 + $0x50] sm:$0xff] }
 0x26a   : > { %v2624_v63 = vsub.f32 %v597_v52, %v684_v62  ;;  %v2626_v0 = vsub.f32 %v592_v46, %v684_v62  ;;  %v847_v46 = vld [vmem:[#allocation7 + $0x138] sm:$0xff]  ;;  %v816_v52 = vld [vmem:[#allocation7 + $0x40] sm:$0xff] }
 0x26b   : > { %v1916_v48 = vpack.c.bf16 %v847_v46, %v846_v45  ;;  %v1890_v55 = vpack.c.bf16 %v817_v53, %v816_v52  ;;  %v819_v62 = vld [vmem:[#allocation7 + $0x58] sm:$0xff]  ;;  %v1336_v45 = vld [vmem:[%s2741_s4] ss:$0 sm:$0xff] }
 0x26c   : > { %v687_v1 = vmul.f32 %v2626_v0, %v2626_v0  ;;  %v688_v2 = vmul.f32 %v2624_v63, %v2624_v63  ;;  %v1894_v7 = vpack.c.bf16 %v819_v62, %v818_v61 }
 0x26d   : > { %1891 = vmatpush3.bf16.msra.mxu0 %v1890_v55 }
 0x26e   : > { %1636 = vmatprep.mubr.f32.mxu1 %v687_v1  ;;  %v1892_v1 = vpack.c.bf16 %v835_v60, %v834_v58 }
 0x26f   : > { %1637 = vmatmul.mubr.f32.vlgmr.msra.gmra.mrb[2].mxu1 %v688_v2  ;;  %v850_v2 = vld [vmem:[#allocation7 + $0x150] sm:$0xff] }
 0x270   : > { %1907 = vmatpush3.bf16.msra.mxu1 %v1904_v11  ;;  %v1924_v5 = vpack.c.bf16 %v851_v3, %v850_v2  ;;  %1893 = vmatprep.subr.bf16.mxu0 %v1892_v1  ;;  %v820_v11 = vld [vmem:[#allocation7 + $0x60] sm:$0xff] }
 0x271   : > { %1909 = vmatprep.subr.bf16.mxu1 %v1908_v23  ;;  %1895 = vmatpush3.bf16.msra.mxu0 %v1894_v7  ;;  %v1898_v17 = vpack.c.bf16 %v821_v12, %v820_v11 }
 0x272   : > { %1897 = vmatprep.subr.bf16.mxu0 %v1896_v10 }
 0x274   : > { %1911 = vmatpush3.bf16.msra.mxu1 %v1908_v23  ;;  %v1902_v23 = vpack.c.bf16 %v823_v22, %v822_v20 }
 0x275   : > { %1913 = vmatprep.subr.bf16.mxu1 %v1912_v36  ;;  %1899 = vmatpush3.bf16.msra.mxu0 %v1898_v17 }
 0x276   : > { %1901 = vmatprep.subr.bf16.mxu0 %v1900_v18 }
 0x278   : > { %1915 = vmatpush3.bf16.msra.mxu1 %v1912_v36 }
 0x279   : > { %1917 = vmatprep.subr.bf16.mxu1 %v1916_v48  ;;  %1903 = vmatpush3.bf16.msra.mxu0 %v1902_v23 }
 0x27a   : > { %1937 = vmatprep.subr.bf16.mxu0 %v2564_v15 }
 0x27c   : > { %1919 = vmatpush3.bf16.msra.mxu1 %v1916_v48  ;;  %v1337_v48 = vld [vmem:[%s2742_s5] ss:$0 sm:$0xff] }
 0x27d   : > { %1921 = vmatprep.subr.bf16.mxu1 %v1920_v59 }
 0x280   : > { %1923 = vmatpush3.bf16.msra.mxu1 %v1920_v59 }
 0x281   : > { %1925 = vmatprep.subr.bf16.mxu1 %v1924_v5 }
 0x284   : > { %1927 = vmatpush3.bf16.msra.mxu1 %v1924_v5 }
 0x285   : > { %1929 = vmatprep.subr.bf16.mxu1 %v1928_v16 }
 0x288   : > { %1931 = vmatpush3.bf16.msra.mxu1 %v1928_v16 }
 0x289   : > { %1933 = vmatprep.subr.bf16.mxu1 %v1932_v27 }
 0x28c   : > { %1935 = vmatpush3.bf16.msra.mxu1 %v1932_v27 }
 0x28d   : > { %1969 = vmatprep.subr.bf16.mxu1 %v2564_v15 }
 0x342   : > { %v1638_v29 = vpop.f32.mrb[2].mxu1 }
 0x343   : > { %v755_v30 = vpop.f32.mrb[3].mxu1 }
 0x344   : > { %v764_v32 = vadd.f32 %v1638_v29, %v755_v30 }
 0x346   : > { %v765_v33 = vrot.slane %v764_v32, 4 }
 0x348   : > { %v766_v35 = vadd.f32 %v765_v33, %v764_v32  ;;  %v1341_v32 = vld [vmem:[%s2743_s6] ss:$0 sm:$0xff] }
 0x34a   : > { %v767_v36 = vrot.slane %v766_v35, 2 }
 0x34c   : > { %v768_v38 = vadd.f32 %v767_v36, %v766_v35  ;;  %v1342_v36 = vld [vmem:[%s2744_s7] ss:$0 sm:$0xff] }
 0x34e   : > { %v769_v39 = vrot.slane %v768_v38, 1 }
 0x350   : > { %v770_v41 = vadd.f32 %v769_v39, %v768_v38 }
 0x352   : > { %v771_v42 = vmul.f32 0.00390625, %v770_v41 }
 0x354   : > { %v772_v43 = vadd.f32 1e-05, %v771_v42 }
 0x356   : > { %2081 = vrsqrt.f32 %v772_v43 }
 0x360   : > { %v2082_v44 = vpop.eup %2081 }
 0x361   : > { %v774_v46 = vmul.f32 %v2082_v44, %v2626_v0  ;;  %v775_v47 = vmul.f32 %v2082_v44, %v2624_v63 }
 0x363   : > { %v782_v51 = vmul.f32 %v1336_v45, %v774_v46  ;;  %v783_v52 = vmul.f32 %v1336_v45, %v775_v47 }
 0x365   : > { %v790_v53 = vadd.f32 %v1337_v48, %v782_v51  ;;  %v791_v54 = vadd.f32 %v1337_v48, %v783_v52 }
 0x367   : > { %v792_v55 = vmax.f32 %v790_v53, 0.0  ;;  %v793_v56 = vmax.f32 %v791_v54, 0.0 }
 0x369   : > { %v796_v57 = vrot.slane %v792_v55, 7  ;;  %920 = vmatprep.mubr.f32.mxu0 %v792_v55  ;;  %v802_v58 = vrot.slane %v792_v55, 1  ;;  %v803_v59 = vrot.slane %v793_v56, 1  ;;  %v797_v60 = vrot.slane %v793_v56, 7 }
 0x36b   : > { %1339 = vmatmul.mubr.msk.f32.vlgmr.msra.gmra.mrb[6].mxu0 %vm2568_vm2, %v796_v57  ;;  %v804_v63 = vsel %vm395_vm0, %v802_v58, %v803_v59  ;;  %v798_v0 = vsel %vm388_vm1, %v796_v57, %v797_v60 }
 0x36c   : > { %925 = vmatprep.mubr.f32.mxu0 %v793_v56  ;;  %1671 = vmatprep.mubr.f32.mxu1 %v804_v63 }
 0x36d   : > { %1672 = vmatmul.mubr.msk.f32.vlgmr.msra.gmra.mrb[4].mxu1 %vm395_vm0, %v803_v59  ;;  %1939 = vmatpush3.bf16.msra.mxu0 %v2564_v15 }
 0x36e   : > { %1941 = vmatprep.subr.bf16.mxu0 %v2574_v21  ;;  %1971 = vmatpush3.bf16.msra.mxu1 %v2564_v15 }
 0x36f   : > { %926 = vmatmul.mubr.f32.gmra.mrb[8].mxu0 %v798_v0  ;;  %1973 = vmatprep.subr.bf16.mxu1 %v2574_v21 }
 0x371   : > { %1943 = vmatpush3.bf16.msra.mxu0 %v2574_v21 }
 0x372   : > { %1945 = vmatprep.subr.bf16.mxu0 %v2585_v25  ;;  %1975 = vmatpush3.bf16.msra.mxu1 %v2574_v21 }
 0x373   : > { %1977 = vmatprep.subr.bf16.mxu1 %v2585_v25 }
 0x375   : > { %1947 = vmatpush3.bf16.msra.mxu0 %v2585_v25 }
 0x376   : > { %1949 = vmatprep.subr.bf16.mxu0 %v2591_v28  ;;  %1979 = vmatpush3.bf16.msra.mxu1 %v2585_v25 }
 0x377   : > { %1981 = vmatprep.subr.bf16.mxu1 %v2591_v28 }
 0x379   : > { %1951 = vmatpush3.bf16.msra.mxu0 %v2591_v28 }
 0x37a   : > { %1953 = vmatprep.subr.bf16.mxu0 %v2597_v31  ;;  %1983 = vmatpush3.bf16.msra.mxu1 %v2591_v28 }
 0x37b   : > { %1985 = vmatprep.subr.bf16.mxu1 %v2597_v31 }
 0x37d   : > { %1955 = vmatpush3.bf16.msra.mxu0 %v2597_v31 }
 0x37e   : > { %1957 = vmatprep.subr.bf16.mxu0 %v2603_v34  ;;  %1987 = vmatpush3.bf16.msra.mxu1 %v2597_v31 }
 0x37f   : > { %1989 = vmatprep.subr.bf16.mxu1 %v2603_v34 }
 0x381   : > { %1959 = vmatpush3.bf16.msra.mxu0 %v2603_v34 }
 0x382   : > { %1961 = vmatprep.subr.bf16.mxu0 %v2612_v37  ;;  %1991 = vmatpush3.bf16.msra.mxu1 %v2603_v34 }
 0x383   : > { %1993 = vmatprep.subr.bf16.mxu1 %v2612_v37 }
 0x385   : > { %1963 = vmatpush3.bf16.msra.mxu0 %v2612_v37 }
 0x386   : > { %1965 = vmatprep.subr.bf16.mxu0 %v2618_v40  ;;  %1995 = vmatpush3.bf16.msra.mxu1 %v2612_v37 }
 0x387   : > { %1997 = vmatprep.subr.bf16.mxu1 %v2618_v40 }
 0x389   : > { %1967 = vmatpush3.bf16.msra.mxu0 %v2618_v40 }
 0x38a   : > { %1999 = vmatpush3.bf16.msra.mxu1 %v2618_v40 }
 0x43e   : > { %v1474_v15 = vpop.f32.mrb[6].mxu0 }
 0x43f   : > { %v1475_v19 = vpop.f32.mrb[7].mxu0 }
 0x440   : > { %v1476_v21 = vadd.f32 %v1475_v19, %v1474_v15  ;;  %v1673_v25 = vpop.f32.mrb[4].mxu1 }
 0x441   : > { %v997_v28 = vpop.f32.mrb[5].mxu1 }
 0x442   : > { %v998_v31 = vadd.f32 %v1476_v21, %v997_v28  ;;  %v1477_v34 = vpop.f32.mrb[8].mxu0 }
 0x443   : > { %v1478_v61 = vpop.f32.mrb[9].mxu0 }
 0x444   : > { %v1479_v62 = vadd.f32 %v1478_v61, %v1477_v34  ;;  %1706 = vmatprep.mubr.f32.mxu0 %v998_v31 }
 0x446   : > { %v1003_v1 = vadd.f32 %v1673_v25, %v1479_v62 }
 0x448   : > { %1707 = vmatmul.mubr.f32.vlgmr.msra.gmra.mrb[10].mxu0 %v1003_v1 }
 0x51b   : > { %v1708_v2 = vpop.f32.mrb[10].mxu0 }
 0x51c   : > { %v1074_v37 = vpop.f32.mrb[11].mxu0 }
 0x51d   : > { %v1083_v3 = vadd.f32 %v1708_v2, %v1074_v37 }
 0x51f   : > { %v1084_v4 = vrot.slane %v1083_v3, 4 }
 0x521   : > { %v1085_v5 = vadd.f32 %v1084_v4, %v1083_v3 }
 0x523   : > { %v1086_v6 = vrot.slane %v1085_v5, 2 }
 0x525   : > { %v1087_v7 = vadd.f32 %v1086_v6, %v1085_v5 }
 0x527   : > { %v1088_v40 = vrot.slane %v1087_v7, 1 }
 0x529   : > { %v1089_v8 = vadd.f32 %v1088_v40, %v1087_v7 }
 0x52b   : > { %v1090_v9 = vmul.f32 0.00390625, %v1089_v8 }
 0x52d   : > { %v1092_v10 = vsub.f32 %v1003_v1, %v1090_v9  ;;  %v1091_v11 = vsub.f32 %v998_v31, %v1090_v9 }
 0x52f   : > { %v1093_v12 = vmul.f32 %v1091_v11, %v1091_v11  ;;  %v1094_v13 = vmul.f32 %v1092_v10, %v1092_v10 }
 0x531   : > { %1741 = vmatprep.mubr.f32.mxu1 %v1093_v12 }
 0x532   : > { %1742 = vmatmul.mubr.f32.vlgmr.msra.gmra.mrb[6].mxu1 %v1094_v13 }
 0x605   : > { %v1743_v14 = vpop.f32.mrb[6].mxu1 }
 0x606   : > { %v1161_v16 = vpop.f32.mrb[7].mxu1 }
 0x607   : > { %v1170_v17 = vadd.f32 %v1743_v14, %v1161_v16 }
 0x609   : > { %v1171_v18 = vrot.slane %v1170_v17, 4 }
 0x60b   : > { %v1172_v20 = vadd.f32 %v1171_v18, %v1170_v17 }
 0x60d   : > { %v1173_v22 = vrot.slane %v1172_v20, 2 }
 0x60f   : > { %v1174_v23 = vadd.f32 %v1173_v22, %v1172_v20 }
 0x611   : > { %v1175_v24 = vrot.slane %v1174_v23, 1 }
 0x613   : > { %v1176_v26 = vadd.f32 %v1175_v24, %v1174_v23 }
 0x615   : > { %v1177_v27 = vmul.f32 0.00390625, %v1176_v26 }
 0x617   : > { %v1178_v29 = vadd.f32 1e-05, %v1177_v27 }
 0x619   : > { %2083 = vrsqrt.f32 %v1178_v29 }
 0x623   : > { %v2084_v30 = vpop.eup %2083 }
 0x624   : > { %v1180_v33 = vmul.f32 %v2084_v30, %v1091_v11  ;;  %v1181_v35 = vmul.f32 %v2084_v30, %v1092_v10 }
 0x626   : > { %v1188_v38 = vmul.f32 %v1341_v32, %v1180_v33  ;;  %v1189_v39 = vmul.f32 %v1341_v32, %v1181_v35 }
 0x628   : > { %v1196_v41 = vadd.f32 %v1342_v36, %v1188_v38  ;;  %v1197_v42 = vadd.f32 %v1342_v36, %v1189_v39 }
 0x62a   : > { %v1198_v43 = vadd.f32 %v1196_v41, %v2555_v49  ;;  %v1199_v44 = vadd.f32 %v1197_v42, %v2558_v50 }
 0x62c   : > { %1200 = vst [vmem:[%s367_s20] sm:$0xff] %v1198_v43  ;;  %1201 = vst [vmem:[%s367_s20 + $0x8] sm:$0xff] %v1199_v44 }
 0x62d   : > { %2212 = shalt.err (!%p2209_p4)
}
 0x62e   : > { %s2213_s17 = scalar_lea.hbm %s2689_s11, 256  ;;  %s2217_s24 = scalar_lea.hbm %s2745_s8, 512 }
 0x62f   : > { %p2214_p9 = scmp.ne.s32.totalorder %s2689_s11, %s2213_s17  ;;  %p2218_p8 = scmp.lt.u32.totalorder %s2689_s11, %s2745_s8 }
 0x630   : > { %p2219_p13 = scmp.lt.u32.totalorder %s2217_s24, %s2213_s17  ;;  %p2221_p10 = scmp.lt.u32.totalorder %s2213_s17, %s2689_s11 }
 0x631   : > { %p2215_p0 = pnand %p2214_p9, %p2483_p5 }
 0x632   : > { %p2220_p6 = por %p2219_p13, %p2218_p8 }
 0x633   : > { %p2216_p11 = pneg %p2215_p0 }
 0x634   : > { %p2222_p3 = por %p2221_p10, %p2220_p6 }
 0x636   : > { %p2223_p7 = pnand %p2222_p3, %p2216_p11 }
 0x638   : > { %2226 = shalt.err (!%p2223_p7)
}
 0x639   : > { %s2282_s15 = smov 128   ;;  %s2283_s27 = smov 8  }
 0x63a   : > { %2014 = dma.vmem_to_hbm [thread:$0]  (%p2483_p5), %s2691_s14, 256, %s2689_s11, %s1203_s9, %s2282_s15, %s2282_s15, %s2283_s27  }
 0x63b PF: > { %s2769_s10 = sld [smem:[#allocation15_spill]]  ;;  %s2770_s13 = sld [smem:[#allocation16_spill]] }
 0x63c   : > { %p2772_p1 = scmp.ge.s32.totalorder %s2273_s30, 2 }
 0x641   : > { %s1231_s19 = sand.u32 1, %s2769_s10   ;;  %p2771_p12 = scmp.ne.s32.totalorder %s2770_s13, 0 }
 0x642   : > { %s1232_s21 = scalar_lea.sflag [#allocation4], %s1231_s19 }
 0x643   : > { %p2031_p2 = pnand %p2772_p1, %p2771_p12 }
 0x645   : > { %2256 = dma.done.wait (!%p2031_p2), %s1232_s21, 256  }
 0x646   : > { %2258 = vsyncadd (!%p2031_p2), %s1232_s21, 4294967040  ;;  %p23_p4 = scmp.ge.s32.totalorder %s2469_s26, 4   ;;  %s2773_s27 = smov %s2265_s28 }
 0x647   : > { %s2774_s28 = smov %s2269_s29  ;;  %s2775_s29 = smov %s2479_s22 }
 0x648   : > { %s2776_s30 = smov %s2469_s26  ;;  %25 = sbr.rel (!%p23_p4) target bundleno = 7 (0x7), region = 109 }
 0x64f   :  { %1237 = vsyncpa [#allocation3], 1 }
 0x650   :  { %1239 = vsyncpa [#allocation3 + $0x1], 1 }
 0x651   :  { %1240 = vsyncpa [#allocation6], 1 }
 0x652   :  { %1241 = vsyncpa [#allocation9], 1 }
 0x653   :  { %1242 = vsyncpa [#allocation4], 1 }
 0x654   :  { %1244 = vsyncpa [#allocation4 + $0x1], 1 }

</bundles_post_ra>
